<compile_context>
chip_gen: v7x
topology: tpu7x:2x2x1
jax: 0.10.0
libtpu: 0.0.40
codegen_flags: <defaults>
</compile_context>

<pallas_src>
import functools

import jax
import jax.numpy as jnp
from jax.experimental import pallas as pl
from jax.experimental.pallas import tpu as pltpu

EPS = 1e-5


def _round_up(x: int, m: int) -> int:
    return (x + m - 1) // m * m


def _cdiv(a: int, b: int) -> int:
    return -(-a // b)


def _vmem_capacity_bytes() -> int:
    try:
        cap = int(pltpu.get_tpu_info().vmem_capacity_bytes)
        if cap > 0:
            return cap
    except Exception:
        pass
    return 64 << 20  # conservative fallback (v7x per-TensorCore VMEM)


def _layernorm_rows(r, gamma_row, beta_row, d_valid):
    """LayerNorm over the last dim of r; rows are independent.

    Padded columns of r are exactly zero (zero-padded x / w / b), so the row
    sum over D_pad equals the sum over the valid D columns.  Centered values in
    padded columns equal -mean, so they are masked out of the variance with a
    cheap (1, D_pad) lane mask that broadcasts in the where.
    """
    d_pad = r.shape[-1]
    inv_d = 1.0 / float(d_valid)
    mean = jnp.sum(r, axis=-1, keepdims=True) * inv_d
    cent = r - mean
    if d_pad != d_valid:
        lane = jax.lax.broadcasted_iota(jnp.int32, (1, d_pad), 1)
        cent = jnp.where(lane < d_valid, cent, 0.0)
    var = jnp.sum(cent * cent, axis=-1, keepdims=True) * inv_d
    normed = cent * jax.lax.rsqrt(var + EPS)
    return normed * gamma_row + beta_row


def _residual_kernel(x_ref, w_ref, b_ref, g_ref, beta_ref, o_ref, *,
                     d_valid, matmul_dtype):
    # Resident-weight path: x_ref (TM, Dp), w_ref (Dp, Dp) input-major.
    lhs = x_ref[...]
    rhs = w_ref[...]
    if matmul_dtype is not None:
        lhs = lhs.astype(matmul_dtype)
        rhs = rhs.astype(matmul_dtype)
    y = jnp.dot(lhs, rhs, preferred_element_type=jnp.float32)
    r = x_ref[...].astype(jnp.float32) + y + b_ref[...].astype(jnp.float32)
    out = _layernorm_rows(r, g_ref[...].astype(jnp.float32),
                          beta_ref[...].astype(jnp.float32), d_valid)
    o_ref[...] = out.astype(o_ref.dtype)


def _residual_kernel_ktiled(xk_ref, xfull_ref, w_ref, b_ref, g_ref, beta_ref,
                            o_ref, acc_ref, *, d_valid, matmul_dtype):
    # K-tiled path: xk_ref (TM, tk) matmul slab, xfull_ref (TM, Dp) residual
    # row (resident across k), w_ref (tk, Dp), acc_ref (TM, Dp) f32 scratch.
    k = pl.program_id(1)

    @pl.when(k == 0)
    def _init():
        acc_ref[...] = jnp.zeros_like(acc_ref)

    lhs = xk_ref[...]
    rhs = w_ref[...]
    if matmul_dtype is not None:
        lhs = lhs.astype(matmul_dtype)
        rhs = rhs.astype(matmul_dtype)
    acc_ref[...] += jnp.dot(lhs, rhs, preferred_element_type=jnp.float32)

    @pl.when(k == pl.num_programs(1) - 1)
    def _finalize():
        r = (xfull_ref[...].astype(jnp.float32) + acc_ref[...]
             + b_ref[...].astype(jnp.float32))
        out = _layernorm_rows(r, g_ref[...].astype(jnp.float32),
                              beta_ref[...].astype(jnp.float32), d_valid)
        o_ref[...] = out.astype(o_ref.dtype)


def residual_forward(x, w_t, b, gamma, beta, *, target_tile_m=1024,
                     force_k_tiling=False, k_tile=None, matmul_dtype=None):
    """x: [B, S, D]; w_t: [D, D] (input-major, i.e. torch W.T); b/gamma/beta: [D]."""
    B, S, D = x.shape
    M = B * S
    dtype = x.dtype
    itemsize = jnp.dtype(dtype).itemsize
    w_itemsize = jnp.dtype(w_t.dtype).itemsize

    D_pad = _round_up(D, 128)

    # Generation-aware VMEM budget (v5e/v6e: 128 MiB, v7x: 64 MiB per core).
    vmem_cap = _vmem_capacity_bytes()
    vmem_limit = max(32 << 20, min(int(vmem_cap * 0.85), vmem_cap))
    budget = vmem_limit - (4 << 20)  # headroom for vectors / internal scratch

    # Resident-weight fit check (assume 2 weight buffers so the decision stays
    # valid even if Buffered(1) is unavailable / ignored by the pipeline).
    resident_w_bytes = 2 * D_pad * D_pad * w_itemsize
    per_row_resident = 4 * D_pad * itemsize  # x + out tiles, double-buffered
    use_k_tiling = force_k_tiling or (
        resident_w_bytes + 8 * per_row_resident + (1 << 20) > budget)

    if use_k_tiling:
        if k_tile is not None:
            tk = int(k_tile)
        else:
            tk = 128
            for cand in (1024, 512, 256):
                if D_pad % cand == 0 and 2 * cand * D_pad * w_itemsize <= budget // 2:
                    tk = cand
                    break
        assert tk % 128 == 0 and D_pad % tk == 0
        fixed_bytes = 2 * tk * D_pad * w_itemsize + 8 * D_pad * 4
        # x_full + out (double-buffered) + x_k slab (double-buffered) + f32 acc
        row_bytes = (4 * D_pad + 2 * tk) * itemsize + 4 * D_pad
    else:
        tk = D_pad
        fixed_bytes = resident_w_bytes + 8 * D_pad * 4
        row_bytes = per_row_resident

    # Largest row tile that fits, then shaped to M so padding is <= 7 rows and
    # (when M allows) the grid has >= 2 steps for megacore sharding.
    tile_cap = max(8, ((budget - fixed_bytes) // row_bytes) // 8 * 8)
    target = max(8, (min(int(target_tile_m), tile_cap) // 8) * 8)
    n_steps = _cdiv(M, target)
    if M >= 16:
        n_steps = max(n_steps, 2)
    tile_m = min(target, _round_up(_cdiv(M, n_steps), 8))
    M_pad = _round_up(M, tile_m)
    grid_m = M_pad // tile_m

    x2 = x.reshape(M, D)
    if M_pad != M or D_pad != D:   # skip the extra HBM copy when not needed
        x2 = jnp.pad(x2, ((0, M_pad - M), (0, D_pad - D)))
    w2 = w_t if D_pad == D else jnp.pad(w_t, ((0, D_pad - D), (0, D_pad - D)))

    def _pad_vec(v):
        v = v.reshape(1, D)
        return v if D_pad == D else jnp.pad(v, ((0, 0), (0, D_pad - D)))

    b2, g2, be2 = _pad_vec(b), _pad_vec(gamma), _pad_vec(beta)

    cost = pl.CostEstimate(
        flops=2 * M * D * D + 10 * M * D,
        transcendentals=M,  # one rsqrt per row
        bytes_accessed=(2 * M * D + D * D + 3 * D) * itemsize,
    )

    def _run(single_buffer_invariants):
        def inv_spec(shape, index_map):
            # Grid-invariant operand: double buffering buys no overlap; halve
            # its residency with a 1-deep pipeline when the API supports it.
            if single_buffer_invariants and hasattr(pl, "Buffered"):
                return pl.BlockSpec(shape, index_map,
                                    pipeline_mode=pl.Buffered(1))
            return pl.BlockSpec(shape, index_map)

        if use_k_tiling:
            grid = (grid_m, D_pad // tk)
            kernel = functools.partial(_residual_kernel_ktiled, d_valid=D,
                                       matmul_dtype=matmul_dtype)
            in_specs = [
                pl.BlockSpec((tile_m, tk), lambda i, k: (i, k)),     # x matmul slab
                pl.BlockSpec((tile_m, D_pad), lambda i, k: (i, 0)),  # x residual row
                pl.BlockSpec((tk, D_pad), lambda i, k: (k, 0)),      # weight K-block
                inv_spec((1, D_pad), lambda i, k: (0, 0)),           # bias
                inv_spec((1, D_pad), lambda i, k: (0, 0)),           # ln gamma
                inv_spec((1, D_pad), lambda i, k: (0, 0)),           # ln beta
            ]
            out_spec = pl.BlockSpec((tile_m, D_pad), lambda i, k: (i, 0))
            scratch = [pltpu.VMEM((tile_m, D_pad), jnp.float32)]
            semantics = ("parallel", "arbitrary")
            args = (x2, x2, w2, b2, g2, be2)
        else:
            grid = (grid_m,)
            kernel = functools.partial(_residual_kernel, d_valid=D,
                                       matmul_dtype=matmul_dtype)
            in_specs = [
                pl.BlockSpec((tile_m, D_pad), lambda i: (i, 0)),     # x rows
                inv_spec((D_pad, D_pad), lambda i: (0, 0)),          # resident weight
                inv_spec((1, D_pad), lambda i: (0, 0)),              # bias
                inv_spec((1, D_pad), lambda i: (0, 0)),              # ln gamma
                inv_spec((1, D_pad), lambda i: (0, 0)),              # ln beta
            ]
            out_spec = pl.BlockSpec((tile_m, D_pad), lambda i: (i, 0))
            scratch = []
            semantics = ("parallel",)
            args = (x2, w2, b2, g2, be2)

        return pl.pallas_call(
            kernel,
            out_shape=jax.ShapeDtypeStruct((M_pad, D_pad), dtype),
            grid_spec=pltpu.PrefetchScalarGridSpec(
                num_scalar_prefetch=0,
                grid=grid,
                in_specs=in_specs,
                out_specs=out_spec,
                scratch_shapes=scratch,
            ),
            compiler_params=pltpu.CompilerParams(
                dimension_semantics=semantics,
                vmem_limit_bytes=int(vmem_limit),
            ),
            cost_estimate=cost,
        )(*args)

    try:
        out2 = _run(True)
    except Exception:
        # Fallback for JAX builds without BlockSpec(pipeline_mode=pl.Buffered(1)).
        out2 = _run(False)

    if M_pad != M or D_pad != D:
        out2 = out2[:M, :D]
    return out2.reshape(B, S, D)


def residual_reference(x, w_t, b, gamma, beta):
    y = jnp.einsum("bsd,de->bse", x.astype(jnp.float32), w_t.astype(jnp.float32),
                   precision=jax.lax.Precision.HIGHEST) + b.astype(jnp.float32)
    r = x.astype(jnp.float32) + y
    mean = jnp.mean(r, axis=-1, keepdims=True)
    var = jnp.mean((r - mean) ** 2, axis=-1, keepdims=True)
    normed = (r - mean) * jax.lax.rsqrt(var + EPS)
    return (normed * gamma + beta).astype(x.dtype)


if __name__ == "__main__":
    def make_inputs(B, S, D, key):
        kx, kw, kb = jax.random.split(key, 3)
        x = jax.random.normal(kx, (B, S, D), dtype=jnp.float32)
        # nn.Linear(D, D): weight [D, D], bias [D]  (pass weight transposed)
        w_t = jax.random.normal(kw, (D, D), dtype=jnp.float32) * (1.0 / jnp.sqrt(D))
        b = jax.random.normal(kb, (D,), dtype=jnp.float32) * 0.01
        # nn.LayerNorm(D): gamma=1, beta=0 at init
        gamma = jnp.ones((D,), dtype=jnp.float32)
        beta = jnp.zeros((D,), dtype=jnp.float32)
        return x, w_t, b, gamma, beta

    key = jax.random.PRNGKey(0)
    k1, k2 = jax.random.split(key)

    # Test 1: resident-weight path (D=32 padded to 128, masked LayerNorm stats).
    x, w_t, b, gamma, beta = make_inputs(2, 8, 32, k1)
    out = residual_forward(x, w_t, b, gamma, beta)
    jax.block_until_ready(out)
    ref = residual_reference(x, w_t, b, gamma, beta)
    assert out.shape == (2, 8, 32)
    assert jnp.allclose(out, ref, atol=1e-4, rtol=1e-4)

    # Test 2: forced K-tiled accumulation path (D=256, tk=128 -> 2 K steps).
    x2, w_t2, b2, gamma2, beta2 = make_inputs(2, 8, 256, k2)
    out2 = residual_forward(x2, w_t2, b2, gamma2, beta2,
                            force_k_tiling=True, k_tile=128)
    jax.block_until_ready(out2)
    ref2 = residual_reference(x2, w_t2, b2, gamma2, beta2)
    assert out2.shape == (2, 8, 256)
    assert jnp.allclose(out2, ref2, atol=1e-3, rtol=1e-3)

    print("KERNEL_OK")
</pallas_src>

<mosaic_0001>
module attributes {stable_mosaic.version = 11 : i64} {
  func.func @_residual_kernel(%arg0: i32, %arg1: memref<8x128xf32, #tpu.memory_space<vmem>>, %arg2: memref<128x128xf32, #tpu.memory_space<vmem>>, %arg3: memref<1x128xf32, #tpu.memory_space<vmem>>, %arg4: memref<1x128xf32, #tpu.memory_space<vmem>>, %arg5: memref<1x128xf32, #tpu.memory_space<vmem>>, %arg6: memref<8x128xf32, #tpu.memory_space<vmem>>) attributes {dimension_semantics = [#tpu.dimension_semantics<parallel>], iteration_bounds = array<i64: 2>, scalar_prefetch = 0 : i64, scratch_operands = 0 : i64, tpu.core_type = #tpu.core_type<tc>, window_params = [{transform_indices = @transform_0, window_bounds = array<i64: 8, 128>}, {pipeline_mode = #tpu.pipeline_mode<synchronous>, transform_indices = @transform_1, window_bounds = array<i64: 128, 128>}, {pipeline_mode = #tpu.pipeline_mode<synchronous>, transform_indices = @transform_2, window_bounds = array<i64: 1, 128>}, {pipeline_mode = #tpu.pipeline_mode<synchronous>, transform_indices = @transform_3, window_bounds = array<i64: 1, 128>}, {pipeline_mode = #tpu.pipeline_mode<synchronous>, transform_indices = @transform_4, window_bounds = array<i64: 1, 128>}, {transform_indices = @transform_5, window_bounds = array<i64: 8, 128>}]} {
    %c0 = arith.constant 0 : index
    %c0_0 = arith.constant 0 : index
    %0 = vector.load %arg1[%c0, %c0_0] : memref<8x128xf32, #tpu.memory_space<vmem>>, vector<8x128xf32>
    %c0_1 = arith.constant 0 : index
    %c0_2 = arith.constant 0 : index
    %1 = vector.load %arg2[%c0_1, %c0_2] : memref<128x128xf32, #tpu.memory_space<vmem>>, vector<128x128xf32>
    %cst = arith.constant dense<0.000000e+00> : vector<8x128xf32>
    %2 = tpu.matmul %0, %1, %cst {dimension_numbers = #tpu.dot_dimension_numbers<[1], [0], [0], [1], [0, 0, 1, 1], [], []>} : vector<8x128xf32>, vector<128x128xf32>, vector<8x128xf32> -> vector<8x128xf32>
    %c0_3 = arith.constant 0 : index
    %c0_4 = arith.constant 0 : index
    %3 = vector.load %arg1[%c0_3, %c0_4] : memref<8x128xf32, #tpu.memory_space<vmem>>, vector<8x128xf32>
    %4 = arith.addf %3, %2 : vector<8x128xf32>
    %c0_5 = arith.constant 0 : index
    %c0_6 = arith.constant 0 : index
    %5 = vector.load %arg3[%c0_5, %c0_6] : memref<1x128xf32, #tpu.memory_space<vmem>>, vector<1x128xf32>
    %6 = vector.broadcast %5 : vector<1x128xf32> to vector<8x128xf32>
    %7 = arith.addf %4, %6 : vector<8x128xf32>
    %c0_7 = arith.constant 0 : index
    %c0_8 = arith.constant 0 : index
    %8 = vector.load %arg4[%c0_7, %c0_8] : memref<1x128xf32, #tpu.memory_space<vmem>>, vector<1x128xf32>
    %c0_9 = arith.constant 0 : index
    %c0_10 = arith.constant 0 : index
    %9 = vector.load %arg5[%c0_9, %c0_10] : memref<1x128xf32, #tpu.memory_space<vmem>>, vector<1x128xf32>
    %cst_11 = arith.constant dense<0.000000e+00> : vector<8xf32>
    %10 = vector.multi_reduction <add>, %7, %cst_11 [1] : vector<8x128xf32> to vector<8xf32>
    %11 = vector.shape_cast %10 : vector<8xf32> to vector<8x1xf32>
    %cst_12 = arith.constant 3.125000e-02 : f32
    %12 = vector.broadcast %cst_12 : f32 to vector<8x1xf32>
    %13 = arith.mulf %11, %12 : vector<8x1xf32>
    %14 = vector.broadcast %13 : vector<8x1xf32> to vector<8x128xf32>
    %15 = arith.subf %7, %14 : vector<8x128xf32>
    %16 = tpu.iota {dimensions = array<i32: 1>} : vector<1x128xi32>
    %c32_i32 = arith.constant 32 : i32
    %17 = vector.broadcast %c32_i32 : i32 to vector<1x128xi32>
    %18 = arith.cmpi slt, %16, %17 : vector<1x128xi32>
    %cst_13 = arith.constant 0.000000e+00 : f32
    %19 = vector.shape_cast %18 : vector<1x128xi1> to vector<1x128xi1>
    %20 = vector.broadcast %19 : vector<1x128xi1> to vector<8x128xi1>
    %21 = vector.broadcast %cst_13 : f32 to vector<8x128xf32>
    %22 = arith.select %20, %15, %21 : vector<8x128xi1>, vector<8x128xf32>
    %23 = arith.mulf %22, %22 : vector<8x128xf32>
    %cst_14 = arith.constant dense<0.000000e+00> : vector<8xf32>
    %24 = vector.multi_reduction <add>, %23, %cst_14 [1] : vector<8x128xf32> to vector<8xf32>
    %25 = vector.shape_cast %24 : vector<8xf32> to vector<8x1xf32>
    %cst_15 = arith.constant 3.125000e-02 : f32
    %26 = vector.broadcast %cst_15 : f32 to vector<8x1xf32>
    %27 = arith.mulf %25, %26 : vector<8x1xf32>
    %cst_16 = arith.constant 9.99999974E-6 : f32
    %28 = vector.broadcast %cst_16 : f32 to vector<8x1xf32>
    %29 = arith.addf %27, %28 : vector<8x1xf32>
    %30 = math.rsqrt %29 : vector<8x1xf32>
    %31 = vector.broadcast %30 : vector<8x1xf32> to vector<8x128xf32>
    %32 = arith.mulf %22, %31 : vector<8x128xf32>
    %33 = vector.broadcast %8 : vector<1x128xf32> to vector<8x128xf32>
    %34 = arith.mulf %32, %33 : vector<8x128xf32>
    %35 = vector.broadcast %9 : vector<1x128xf32> to vector<8x128xf32>
    %36 = arith.addf %34, %35 : vector<8x128xf32>
    %c0_17 = arith.constant 0 : index
    %c0_18 = arith.constant 0 : index
    %37 = vector.load %arg6[%c0_17, %c0_18] : memref<8x128xf32, #tpu.memory_space<vmem>>, vector<8x128xf32>
    tpu.vector_store %arg6[%c0_17, %c0_18], %36 {strides = array<i32>} : memref<8x128xf32, #tpu.memory_space<vmem>>, vector<8x128xf32>,
    return
  }
  func.func @transform_0(%arg0: i32) -> (i32, i32) {
    %c0_i32 = arith.constant 0 : i32
    %c0_i32_0 = arith.constant 0 : i32
    return %arg0, %c0_i32 : i32, i32
  }
  func.func @transform_1(%arg0: i32) -> (i32, i32) {
    %c0_i32 = arith.constant 0 : i32
    %c0_i32_0 = arith.constant 0 : i32
    %c0_i32_1 = arith.constant 0 : i32
    return %c0_i32, %c0_i32_0 : i32, i32
  }
  func.func @transform_2(%arg0: i32) -> (i32, i32) {
    %c0_i32 = arith.constant 0 : i32
    %c0_i32_0 = arith.constant 0 : i32
    %c0_i32_1 = arith.constant 0 : i32
    return %c0_i32, %c0_i32_0 : i32, i32
  }
  func.func @transform_3(%arg0: i32) -> (i32, i32) {
    %c0_i32 = arith.constant 0 : i32
    %c0_i32_0 = arith.constant 0 : i32
    %c0_i32_1 = arith.constant 0 : i32
    return %c0_i32, %c0_i32_0 : i32, i32
  }
  func.func @transform_4(%arg0: i32) -> (i32, i32) {
    %c0_i32 = arith.constant 0 : i32
    %c0_i32_0 = arith.constant 0 : i32
    %c0_i32_1 = arith.constant 0 : i32
    return %c0_i32, %c0_i32_0 : i32, i32
  }
  func.func @transform_5(%arg0: i32) -> (i32, i32) {
    %c0_i32 = arith.constant 0 : i32
    %c0_i32_0 = arith.constant 0 : i32
    return %arg0, %c0_i32 : i32, i32
  }
}

module attributes {stable_mosaic.version = 11 : i64} {
  func.func @_residual_kernel(%arg0: i32, %arg1: memref<8x128xf32, #tpu.memory_space<vmem>>, %arg2: memref<128x128xf32, #tpu.memory_space<vmem>>, %arg3: memref<1x128xf32, #tpu.memory_space<vmem>>, %arg4: memref<1x128xf32, #tpu.memory_space<vmem>>, %arg5: memref<1x128xf32, #tpu.memory_space<vmem>>, %arg6: memref<8x128xf32, #tpu.memory_space<vmem>>) attributes {dimension_semantics = [#tpu.dimension_semantics<parallel>], iteration_bounds = array<i64: 2>, scalar_prefetch = 0 : i64, scratch_operands = 0 : i64, tpu.core_type = #tpu.core_type<tc>, window_params = [{transform_indices = @transform_0, window_bounds = array<i64: 8, 128>}, {pipeline_mode = #tpu.pipeline_mode<synchronous>, transform_indices = @transform_1, window_bounds = array<i64: 128, 128>}, {pipeline_mode = #tpu.pipeline_mode<synchronous>, transform_indices = @transform_2, window_bounds = array<i64: 1, 128>}, {pipeline_mode = #tpu.pipeline_mode<synchronous>, transform_indices = @transform_3, window_bounds = array<i64: 1, 128>}, {pipeline_mode = #tpu.pipeline_mode<synchronous>, transform_indices = @transform_4, window_bounds = array<i64: 1, 128>}, {transform_indices = @transform_5, window_bounds = array<i64: 8, 128>}]} {
    %c0 = arith.constant 0 : index
    %c0_0 = arith.constant 0 : index
    %0 = vector.load %arg1[%c0, %c0_0] : memref<8x128xf32, #tpu.memory_space<vmem>>, vector<8x128xf32>
    %c0_1 = arith.constant 0 : index
    %c0_2 = arith.constant 0 : index
    %1 = vector.load %arg2[%c0_1, %c0_2] : memref<128x128xf32, #tpu.memory_space<vmem>>, vector<128x128xf32>
    %cst = arith.constant dense<0.000000e+00> : vector<8x128xf32>
    %2 = tpu.matmul %0, %1, %cst {dimension_numbers = #tpu.dot_dimension_numbers<[1], [0], [0], [1], [0, 0, 1, 1], [], []>} : vector<8x128xf32>, vector<128x128xf32>, vector<8x128xf32> -> vector<8x128xf32>
    %c0_3 = arith.constant 0 : index
    %c0_4 = arith.constant 0 : index
    %3 = vector.load %arg1[%c0_3, %c0_4] : memref<8x128xf32, #tpu.memory_space<vmem>>, vector<8x128xf32>
    %4 = arith.addf %3, %2 : vector<8x128xf32>
    %c0_5 = arith.constant 0 : index
    %c0_6 = arith.constant 0 : index
    %5 = vector.load %arg3[%c0_5, %c0_6] : memref<1x128xf32, #tpu.memory_space<vmem>>, vector<1x128xf32>
    %6 = vector.broadcast %5 : vector<1x128xf32> to vector<8x128xf32>
    %7 = arith.addf %4, %6 : vector<8x128xf32>
    %c0_7 = arith.constant 0 : index
    %c0_8 = arith.constant 0 : index
    %8 = vector.load %arg4[%c0_7, %c0_8] : memref<1x128xf32, #tpu.memory_space<vmem>>, vector<1x128xf32>
    %c0_9 = arith.constant 0 : index
    %c0_10 = arith.constant 0 : index
    %9 = vector.load %arg5[%c0_9, %c0_10] : memref<1x128xf32, #tpu.memory_space<vmem>>, vector<1x128xf32>
    %cst_11 = arith.constant dense<0.000000e+00> : vector<8xf32>
    %10 = vector.multi_reduction <add>, %7, %cst_11 [1] : vector<8x128xf32> to vector<8xf32>
    %11 = vector.shape_cast %10 : vector<8xf32> to vector<8x1xf32>
    %cst_12 = arith.constant 3.125000e-02 : f32
    %12 = vector.broadcast %cst_12 : f32 to vector<8x1xf32>
    %13 = arith.mulf %11, %12 : vector<8x1xf32>
    %14 = vector.broadcast %13 : vector<8x1xf32> to vector<8x128xf32>
    %15 = arith.subf %7, %14 : vector<8x128xf32>
    %16 = tpu.iota {dimensions = array<i32: 1>} : vector<1x128xi32>
    %c32_i32 = arith.constant 32 : i32
    %17 = vector.broadcast %c32_i32 : i32 to vector<1x128xi32>
    %18 = arith.cmpi slt, %16, %17 : vector<1x128xi32>
    %cst_13 = arith.constant 0.000000e+00 : f32
    %19 = vector.shape_cast %18 : vector<1x128xi1> to vector<1x128xi1>
    %20 = vector.broadcast %19 : vector<1x128xi1> to vector<8x128xi1>
    %21 = vector.broadcast %cst_13 : f32 to vector<8x128xf32>
    %22 = arith.select %20, %15, %21 : vector<8x128xi1>, vector<8x128xf32>
    %23 = arith.mulf %22, %22 : vector<8x128xf32>
    %cst_14 = arith.constant dense<0.000000e+00> : vector<8xf32>
    %24 = vector.multi_reduction <add>, %23, %cst_14 [1] : vector<8x128xf32> to vector<8xf32>
    %25 = vector.shape_cast %24 : vector<8xf32> to vector<8x1xf32>
    %cst_15 = arith.constant 3.125000e-02 : f32
    %26 = vector.broadcast %cst_15 : f32 to vector<8x1xf32>
    %27 = arith.mulf %25, %26 : vector<8x1xf32>
    %cst_16 = arith.constant 9.99999974E-6 : f32
    %28 = vector.broadcast %cst_16 : f32 to vector<8x1xf32>
    %29 = arith.addf %27, %28 : vector<8x1xf32>
    %30 = math.rsqrt %29 : vector<8x1xf32>
    %31 = vector.broadcast %30 : vector<8x1xf32> to vector<8x128xf32>
    %32 = arith.mulf %22, %31 : vector<8x128xf32>
    %33 = vector.broadcast %8 : vector<1x128xf32> to vector<8x128xf32>
    %34 = arith.mulf %32, %33 : vector<8x128xf32>
    %35 = vector.broadcast %9 : vector<1x128xf32> to vector<8x128xf32>
    %36 = arith.addf %34, %35 : vector<8x128xf32>
    %c0_17 = arith.constant 0 : index
    %c0_18 = arith.constant 0 : index
    %37 = vector.load %arg6[%c0_17, %c0_18] : memref<8x128xf32, #tpu.memory_space<vmem>>, vector<8x128xf32>
    tpu.vector_store %arg6[%c0_17, %c0_18], %36 {strides = array<i32>} : memref<8x128xf32, #tpu.memory_space<vmem>>, vector<8x128xf32>,
    return
  }
  func.func @transform_0(%arg0: i32) -> (i32, i32) {
    %c0_i32 = arith.constant 0 : i32
    %c0_i32_0 = arith.constant 0 : i32
    return %arg0, %c0_i32 : i32, i32
  }
  func.func @transform_1(%arg0: i32) -> (i32, i32) {
    %c0_i32 = arith.constant 0 : i32
    %c0_i32_0 = arith.constant 0 : i32
    %c0_i32_1 = arith.constant 0 : i32
    return %c0_i32, %c0_i32_0 : i32, i32
  }
  func.func @transform_2(%arg0: i32) -> (i32, i32) {
    %c0_i32 = arith.constant 0 : i32
    %c0_i32_0 = arith.constant 0 : i32
    %c0_i32_1 = arith.constant 0 : i32
    return %c0_i32, %c0_i32_0 : i32, i32
  }
  func.func @transform_3(%arg0: i32) -> (i32, i32) {
    %c0_i32 = arith.constant 0 : i32
    %c0_i32_0 = arith.constant 0 : i32
    %c0_i32_1 = arith.constant 0 : i32
    return %c0_i32, %c0_i32_0 : i32, i32
  }
  func.func @transform_4(%arg0: i32) -> (i32, i32) {
    %c0_i32 = arith.constant 0 : i32
    %c0_i32_0 = arith.constant 0 : i32
    %c0_i32_1 = arith.constant 0 : i32
    return %c0_i32, %c0_i32_0 : i32, i32
  }
  func.func @transform_5(%arg0: i32) -> (i32, i32) {
    %c0_i32 = arith.constant 0 : i32
    %c0_i32_0 = arith.constant 0 : i32
    return %arg0, %c0_i32 : i32, i32
  }
}

</mosaic_0001>

<bundles_post_ra>
// kernel: tpu_custom_call.1
= control target key start
LH: loop header
LB: loop body
LE: loop exit
PB: predicated region body
PF: predicated region fallthrough
CT: control target
= control target key end

     0   :  { %10 = vsyncpa [#allocation3], 0  ;;  %s1016_s0 = inlined_call_operand.hbm [shape: f32[16,128], index: 0, kind: input, shape index: {}]   ;;  %s1017_s1 = inlined_call_operand.hbm [shape: f32[128,128], index: 1, kind: input, shape index: {}]   ;;  %s1018_s2 = inlined_call_operand.vmem [shape: f32[1,128], index: 2, kind: input, shape index: {}]   ;;  %s1019_s3 = inlined_call_operand.vmem [shape: f32[1,128], index: 3, kind: input, shape index: {}]   ;;  %s1020_s4 = inlined_call_operand.vmem [shape: f32[1,128], index: 4, kind: input, shape index: {}]   ;;  %s1021_s5 = inlined_call_operand.hbm [shape: f32[16,128], index: 5, kind: output, shape index: {}]  }
   0x1   :  { %12 = vsyncpa [#allocation3 + $0x1], 0 }
   0x2   :  { %13 = vsyncpa [#allocation6], 0 }
   0x3   :  { %14 = vsyncpa [#allocation4], 0 }
   0x4   :  { %16 = vsyncpa [#allocation4 + $0x1], 0  ;;  %s804_s18 = smov 0   ;;  %s806_s19 = smov 0  }
   0x5   :  { %s808_s20 = smov 0   ;;  %s810_s21 = smov 0  }
   0x6 LB: > { %s825_s22 = sadd.s32 4294967295, %s764_s21   ;;  %s479_s23 = sadd.s32 4294967294, %s764_s21   ;;  %s764_s21 = sphi %s810_s21, %s1041_s21   ;;  %s760_s20 = sphi %s808_s20, %s1040_s20   ;;  %s756_s19 = sphi %s806_s19, %s1039_s19   ;;  %s752_s18 = sphi %s804_s18, %s1038_s18  }
   0x7   : > { %p42_p0 = scmp.ne.s32.totalorder %s756_s19, %s752_s18  ;;  %p1022_p1 = scmp.eq.s32.totalorder %s825_s22, 0 }
   0x8   : > { %p156_p3 = scmp.eq.s32.totalorder %s479_s23, 1  ;;  %p480_p5 = scmp.ge.s32.totalorder %s764_s21, 1 }
   0x9   : > { %p834_p4 = por %p1022_p1, %p42_p0  ;;  %p163_p7 = scmp.lt.s32.totalorder %s764_s21, 3 }
   0xa   : > { %p839_p6 = por %p156_p3, %p42_p0  ;;  %s766_s27 = smov [#allocation5]  }
   0xb   : > { %s1025_s24 = scalar_select %p834_p4, 1, 0 }
   0xc   : > { %s1026_s25 = scalar_select %p839_p6, 1, 0 }
   0xd   : > { %p844_p8 = pnand %p480_p5, %p163_p7  ;;  %s175_s28 = sshll.u32 %s766_s27, 4  ;;  %s848_s28 = int_to_ptr.vmem [resolvable:$true] %s175_s28 }
   0xe   : > { %s860_s30 = sadd.s32 1, %s764_s21   ;;  %s29_s6 = sadd.s32 1, %s760_s20 }
   0xf   : > { %s1027_s26 = scalar_select %p844_p8, 1, 0 }
  0x10   : > { %p580_p9 = pneg %p844_p8  ;;  %s26_s7 = ssub.s32 %s764_s21, %s860_s30 }
  0x11   : > { %s636_s10 = scalar_lea.hbm %s1017_s1, 2048 }
  0x12   : > { %p855_p11 = pnand %p580_p9, %p1022_p1  ;;  %p637_p12 = scmp.ne.s32.totalorder %s1017_s1, %s636_s10 }
  0x13   : > { %p643_p5 = scmp.lt.u32.totalorder %s636_s10, %s1017_s1 }
  0x14   : > { %p638_p13 = pneg %p855_p11 }
  0x16   : > { %p639_p0 = pnand %p638_p13, %p637_p12 }
  0x18   : > { %p640_p3 = pneg %p639_p0 }
  0x1a   : > { %p645_p7 = pnand %p643_p5, %p640_p3 }
  0x1c   : > { %648 = shalt.err (!%p645_p7)
}
  0x1d   : > { %s649_s15 = scalar_lea.vmem %s848_s28, 2048  ;;  %p657_p2 = scmp.lt.s32.totalorder %s848_s28, %s848_s28 }
  0x1e   : > { %p650_p9 = scmp.ne.s32.totalorder %s848_s28, %s649_s15  ;;  %p658_p6 = scmp.lt.s32.totalorder %s649_s15, %s649_s15 }
  0x20   : > { %p652_p10 = pnand %p650_p9, %p638_p13  ;;  %p659_p4 = por %p658_p6, %p657_p2 }
  0x22   : > { %p653_p1 = pneg %p652_p10 }
  0x24   : > { %p660_p8 = pnand %p659_p4, %p653_p1 }
  0x26   : > { %663 = shalt.err (!%p660_p8)
}
  0x27   : > { %s767_s16 = smov 128   ;;  %s768_s17 = smov 8  }
  0x28   : > { %583 = dma.hbm_to_vmem [thread:$0]  (!%p855_p11), %s1017_s1, 2048, %s848_s28, [#allocation6], %s767_s16, %s767_s16, %s768_s17  }
  0x29   : > { %p27_p2 = scmp.eq.s32.totalorder %s26_s7, 0  ;;  %p36_p1 = scmp.ne.s32.totalorder %s760_s20, %s756_s19 }
  0x2a   : > { %p37_p4 = scmp.eq.s32.totalorder %s764_s21, 0  ;;  %p593_p6 = scmp.lt.s32.totalorder %s764_s21, 2 }
  0x2b   : > { %s891_s8 = scalar_select %p27_p2, %s760_s20, %s29_s6  }
  0x2c   : > { %p38_p8 = por %p37_p4, %p36_p1  ;;  %p1029_p10 = scmp.eq.s32.totalorder %s825_s22, 1 }
  0x2d   : > { %s198_s10 = sand.u32 1, %s760_s20   ;;  %s484_s11 = sshll.u32 %s764_s21, 7 }
  0x2e   : > { %p895_p12 = por %p1029_p10, %p36_p1  ;;  %s483_s12 = sshll.u32 %s198_s10, 3 }
  0x2f   : > { %s904_s14 = scalar_lea.hbm %s1016_s0, %s484_s11  ;;  %s202_s28 = scalar_lea.vmem [#allocation2], %s483_s12 }
  0x30   : > { %s209_s6 = sshll.u32 %s202_s28, 4  ;;  %p906_p11 = pnand %p593_p6, %p38_p8  ;;  %s910_s6 = int_to_ptr.vmem [resolvable:$true] %s209_s6 }
  0x31   : > { %s199_s15 = scalar_lea.sflag [#allocation3], %s198_s10  ;;  %s664_s16 = scalar_lea.hbm %s904_s14, 128 }
  0x32   : > { %p665_p13 = scmp.ne.s32.totalorder %s904_s14, %s664_s16  ;;  %p666_p0 = pneg %p906_p11 }
  0x33   : > { %s669_s27 = scalar_lea.hbm %s1016_s0, 256  ;;  %p670_p7 = scmp.lt.u32.totalorder %s904_s14, %s1016_s0 }
  0x34   : > { %p667_p3 = pnand %p666_p0, %p665_p13  ;;  %p671_p9 = scmp.lt.u32.totalorder %s669_s27, %s664_s16 }
  0x35   : > { %p673_p1 = scmp.lt.u32.totalorder %s664_s16, %s904_s14 }
  0x36   : > { %p668_p5 = pneg %p667_p3  ;;  %p672_p2 = por %p671_p9, %p670_p7 }
  0x38   : > { %p674_p4 = por %p673_p1, %p672_p2 }
  0x3a   : > { %p675_p6 = pnand %p674_p4, %p668_p5 }
  0x3c   : > { %678 = shalt.err (!%p675_p6)
}
  0x3d   : > { %s679_s10 = scalar_lea.vmem %s910_s6, 128  ;;  %s769_s29 = smov [#allocation2]  }
  0x3e   : > { %p680_p8 = scmp.ne.s32.totalorder %s910_s6, %s679_s10  ;;  %s684_s13 = sshll.u32 %s769_s29, 4  ;;  %s685_s13 = int_to_ptr.vmem [resolvable:$false] %s684_s13 }
  0x3f   : > { %s686_s28 = scalar_lea.vmem %s685_s13, 256  ;;  %p687_p3 = scmp.lt.s32.totalorder %s910_s6, %s685_s13 }
  0x40   : > { %p682_p10 = pnand %p680_p8, %p666_p0  ;;  %p688_p7 = scmp.lt.s32.totalorder %s686_s28, %s679_s10 }
  0x42   : > { %p683_p13 = pneg %p682_p10  ;;  %p689_p9 = por %p688_p7, %p687_p3 }
  0x44   : > { %p690_p2 = pnand %p689_p9, %p683_p13 }
  0x46   : > { %693 = shalt.err (!%p690_p2)
}
  0x47   : > { %587 = dma.hbm_to_vmem [thread:$0]  (!%p906_p11), %s904_s14, 128, %s910_s6, %s199_s15  }
  0x48   : > { %p1032_p5 = scmp.ne.s32.totalorder %s1027_s26, 0 }
  0x49   : > { %s940_s16 = sand.u32 (!%p1032_p5), 1, %s756_s19   ;;  %p1033_p0 = scmp.ne.s32.totalorder (!%p1032_p5), %s1025_s24, 0 }
  0x4a   : > { %218 = sbr.rel (%p1032_p5) target bundleno = 661 (0x295), region = 40  ;;  %s486_s17 = sshll.u32 (!%p1032_p5), %s940_s16, 3 }
  0x4b   : > { %s221_s23 = scalar_lea.sflag (!%p1032_p5), [#allocation3], %s940_s16  ;;  %s946_s27 = scalar_lea.vmem (!%p1032_p5), [#allocation2], %s486_s17 }
  0x51   : > { %739 = dma.done.wait (%p1033_p0), %s221_s23, 128  }
  0x52   : > { %741 = vsyncadd (%p1033_p0), %s221_s23, 4294967168  ;;  %p1034_p11 = scmp.eq.s32.totalorder %s825_s22, 0 }
  0x54   : > { %743 = dma.done.wait (%p1034_p11), [#allocation6], 2048   ;;  %p1035_p1 = pmov %p1034_p11 }
  0x55   : > { %v770_v0 = vmov 0.0|0.0   ;;  %vm771_vm0 = vmmov 0   ;;  %v772_v1 = vmov 0.0   ;;  %v256_v2 = vld [vmem:[#allocation5] sm:$0xff]  ;;  %v257_v3 = vld [vmem:[#allocation5 + $0x8] sm:$0xff]  ;;  %v258_v4 = vld [vmem:[#allocation5 + $0x10] sm:$0xff]  ;;  %v357_v32 = vlaneseq }
  0x56   : > { %745 = vsyncadd (%p1035_p1), [#allocation6], 4294965248  ;;  %548 = vmatprep.subr.bf16.mxu0 %v770_v0  ;;  %545 = vmatprep.mubr.msk.f32.mxu0 %vm771_vm0, %v772_v1  ;;  %v549_v5 = vpack.c.bf16 %v257_v3, %v256_v2  ;;  %v259_v6 = vld [vmem:[#allocation5 + $0x18] sm:$0xff]  ;;  %v260_v8 = vld [vmem:[#allocation5 + $0x20] sm:$0xff]  ;;  %s493_s11 = sshll.u32 %s825_s22, 7  ;;  %s254_s12 = scalar_lea.vmem [#allocation7], %s486_s17 }
  0x57   : > { %v552_v7 = vpack.c.bf16 %v259_v6, %v258_v4  ;;  %v261_v9 = vld [vmem:[#allocation5 + $0x28] sm:$0xff]  ;;  %v262_v11 = vld [vmem:[#allocation5 + $0x30] sm:$0xff]  ;;  %v263_v12 = vld [vmem:[#allocation5 + $0x38] sm:$0xff]  ;;  %v358_v33 = vand.u32 127, %v357_v32  ;;  %s399_s10 = sshll.u32 %s254_s12, 4  ;;  %s972_s28 = scalar_lea.hbm %s1021_s5, %s493_s11  ;;  %s974_s10 = int_to_ptr.vmem [resolvable:$true] %s399_s10 }
  0x58   : > { %550 = vmatpush3.bf16.msra.mxu0 %v549_v5  ;;  %v555_v10 = vpack.c.bf16 %v261_v9, %v260_v8  ;;  %v558_v13 = vpack.c.bf16 %v263_v12, %v262_v11  ;;  %v264_v14 = vld [vmem:[#allocation5 + $0x40] sm:$0xff]  ;;  %v265_v15 = vld [vmem:[#allocation5 + $0x48] sm:$0xff]  ;;  %v266_v17 = vld [vmem:[#allocation5 + $0x50] sm:$0xff]  ;;  %s386_s23 = scalar_lea.sflag [#allocation4], %s940_s16  ;;  %s773_s22 = smov [#allocation7]  }
  0x59   : > { %551 = vmatprep.subr.bf16.mxu0 %v770_v0  ;;  %v561_v16 = vpack.c.bf16 %v265_v15, %v264_v14  ;;  %v267_v18 = vld [vmem:[#allocation5 + $0x58] sm:$0xff]  ;;  %v268_v20 = vld [vmem:[#allocation5 + $0x60] sm:$0xff]  ;;  %v269_v21 = vld [vmem:[#allocation5 + $0x68] sm:$0xff]  ;;  %vm359_vm1 = vcmp.lt.s32.totalorder %v358_v33, 32  ;;  %s698_s17 = sshll.u32 %s773_s22, 4  ;;  %s699_s17 = int_to_ptr.vmem [resolvable:$false] %s698_s17 }
  0x5a   : > { %v564_v19 = vpack.c.bf16 %v267_v18, %v266_v17  ;;  %v567_v22 = vpack.c.bf16 %v269_v21, %v268_v20  ;;  %v270_v23 = vld [vmem:[#allocation5 + $0x70] sm:$0xff]  ;;  %v271_v24 = vld [vmem:[#allocation5 + $0x78] sm:$0xff]  ;;  %s700_s24 = scalar_lea.vmem %s699_s17, 256  ;;  %p701_p10 = scmp.lt.s32.totalorder %s974_s10, %s699_s17 }
  0x5b   : > { %v570_v25 = vpack.c.bf16 %v271_v24, %v270_v23  ;;  %v255_v26 = vld [vmem:[%s946_s27] sm:$0xff]  ;;  %s694_s27 = scalar_lea.vmem %s974_s10, 128 }
  0x5c   : > { %553 = vmatpush3.bf16.msra.mxu0 %v552_v7  ;;  %v489_v28 = vld [vmem:[%s1018_s2] ss:$0 sm:$0xff]  ;;  %p695_p4 = scmp.ne.s32.totalorder %s974_s10, %s694_s27  ;;  %p702_p13 = scmp.lt.s32.totalorder %s700_s24, %s694_s27 }
  0x5d   : > { %554 = vmatprep.subr.bf16.mxu0 %v770_v0  ;;  %v490_v43 = vld [vmem:[%s1019_s3] ss:$0 sm:$0xff] }
  0x5e   : > { %v491_v45 = vld [vmem:[%s1020_s4] ss:$0 sm:$0xff]  ;;  %p696_p6 = pnand %p695_p4, %p895_p12  ;;  %p703_p3 = por %p702_p13, %p701_p10 }
  0x60   : > { %556 = vmatpush3.bf16.msra.mxu0 %v555_v10  ;;  %p697_p8 = pneg %p696_p6 }
  0x61   : > { %557 = vmatprep.subr.bf16.mxu0 %v770_v0 }
  0x62   : > { %p704_p7 = pnand %p703_p3, %p697_p8 }
  0x64   : > { %559 = vmatpush3.bf16.msra.mxu0 %v558_v13 }
  0x65   : > { %560 = vmatprep.subr.bf16.mxu0 %v770_v0 }
  0x68   : > { %562 = vmatpush3.bf16.msra.mxu0 %v561_v16 }
  0x69   : > { %563 = vmatprep.subr.bf16.mxu0 %v770_v0 }
  0x6c   : > { %565 = vmatpush3.bf16.msra.mxu0 %v564_v19 }
  0x6d   : > { %566 = vmatprep.subr.bf16.mxu0 %v770_v0 }
  0x70   : > { %568 = vmatpush3.bf16.msra.mxu0 %v567_v22 }
  0x71   : > { %569 = vmatprep.subr.bf16.mxu0 %v770_v0 }
  0x74   : > { %571 = vmatpush3.bf16.msra.mxu0 %v570_v25 }
  0x77   : > { %546 = vmatmul.mubr.f32.vlgmr.msra.gmra.mrb[0].mxu0 %v255_v26 }
 0x14a   : > { %v338_v27 = vpop.f32.mrb[0].mxu0 }
 0x14b   : > { %v342_v29 = vadd.f32 %v338_v27, %v255_v26  ;;  %v547_v30 = vpop.f32.mrb[1].mxu0 }
 0x14d   : > { %v350_v31 = vadd.f32 %v489_v28, %v342_v29 }
 0x14f   : > { %353 = vadd.xlane.f32.xlu0 %v350_v31 }
 0x1dc   : > { %v354_v34 = vpop.xlane.xlu0 %353 }
 0x1dd   : > { %v355_v35 = vmul.f32 0.03125, %v354_v34 }
 0x1df   : > { %v356_v36 = vsub.f32 %v350_v31, %v355_v35 }
 0x1e1   : > { %v362_v37 = vsel %vm359_vm1, %v356_v36, 0.0 }
 0x1e2   : > { %v363_v38 = vmul.f32 %v362_v37, %v362_v37 }
 0x1e4   : > { %364 = vadd.xlane.f32.xlu0 %v363_v38 }
 0x271   : > { %v365_v39 = vpop.xlane.xlu0 %364 }
 0x272   : > { %v366_v40 = vmul.f32 0.03125, %v365_v39 }
 0x274   : > { %v367_v41 = vadd.f32 1e-05, %v366_v40 }
 0x276   : > { %634 = vrsqrt.f32 %v367_v41 }
 0x280   : > { %v635_v42 = vpop.eup %634 }
 0x281   : > { %v369_v44 = vmul.f32 %v635_v42, %v362_v37 }
 0x283   : > { %v376_v46 = vmul.f32 %v490_v43, %v369_v44 }
 0x285   : > { %v383_v47 = vadd.f32 %v491_v45, %v376_v46 }
 0x287   : > { %384 = vst [vmem:[%s254_s12] sm:$0xff] %v383_v47 }
 0x288   : > { %707 = shalt.err (!%p704_p7)
}
 0x289   : > { %s708_s16 = scalar_lea.hbm %s972_s28, 128  ;;  %s712_s6 = scalar_lea.hbm %s1021_s5, 256 }
 0x28a   : > { %p709_p9 = scmp.ne.s32.totalorder %s972_s28, %s708_s16  ;;  %p713_p0 = scmp.lt.u32.totalorder %s972_s28, %s1021_s5 }
 0x28b   : > { %p714_p11 = scmp.lt.u32.totalorder %s712_s6, %s708_s16  ;;  %p716_p4 = scmp.lt.u32.totalorder %s708_s16, %s972_s28 }
 0x28c   : > { %p710_p2 = pnand %p709_p9, %p895_p12 }
 0x28d   : > { %p715_p1 = por %p714_p11, %p713_p0 }
 0x28e   : > { %p711_p5 = pneg %p710_p2 }
 0x28f   : > { %p717_p6 = por %p716_p4, %p715_p1 }
 0x291   : > { %p718_p8 = pnand %p717_p6, %p711_p5 }
 0x293   : > { %721 = shalt.err (!%p718_p8)
}
 0x294   : > { %578 = dma.vmem_to_hbm [thread:$0]  (%p895_p12), %s974_s10, 128, %s972_s28, %s386_s23  }
 0x295 PF: > { %s411_s11 = sand.u32 1, %s752_s18   ;;  %p1036_p10 = scmp.ne.s32.totalorder %s1026_s25, 0 }
 0x296   : > { %p1037_p13 = scmp.ge.s32.totalorder %s764_s21, 2  ;;  %s412_s12 = scalar_lea.sflag [#allocation4], %s411_s11 }
 0x298   : > { %p589_p3 = pnand %p1037_p13, %p1036_p10 }
 0x29a   : > { %747 = dma.done.wait (!%p589_p3), %s412_s12, 128  }
 0x29b   : > { %749 = vsyncadd (!%p589_p3), %s412_s12, 4294967168  ;;  %p19_p7 = scmp.ge.s32.totalorder %s860_s30, 4   ;;  %s1038_s18 = smov %s756_s19 }
 0x29c   : > { %s1039_s19 = smov %s760_s20  ;;  %s1040_s20 = smov %s891_s8 }
 0x29d   : > { %s1041_s21 = smov %s860_s30  ;;  %21 = sbr.rel (!%p19_p7) target bundleno = 6 (0x6), region = 89 }
 0x2a4   :  { %417 = vsyncpa [#allocation3], 1 }
 0x2a5   :  { %419 = vsyncpa [#allocation3 + $0x1], 1 }
 0x2a6   :  { %420 = vsyncpa [#allocation6], 1 }
 0x2a7   :  { %421 = vsyncpa [#allocation4], 1 }
 0x2a8   :  { %423 = vsyncpa [#allocation4 + $0x1], 1 }

// kernel: tpu_custom_call.1
= control target key start
LH: loop header
LB: loop body
LE: loop exit
PB: predicated region body
PF: predicated region fallthrough
CT: control target
= control target key end

     0   :  { %10 = vsyncpa [#allocation3], 0  ;;  %s1016_s0 = inlined_call_operand.hbm [shape: f32[16,128], index: 0, kind: input, shape index: {}]   ;;  %s1017_s1 = inlined_call_operand.hbm [shape: f32[128,128], index: 1, kind: input, shape index: {}]   ;;  %s1018_s2 = inlined_call_operand.vmem [shape: f32[1,128], index: 2, kind: input, shape index: {}]   ;;  %s1019_s3 = inlined_call_operand.vmem [shape: f32[1,128], index: 3, kind: input, shape index: {}]   ;;  %s1020_s4 = inlined_call_operand.vmem [shape: f32[1,128], index: 4, kind: input, shape index: {}]   ;;  %s1021_s5 = inlined_call_operand.hbm [shape: f32[16,128], index: 5, kind: output, shape index: {}]  }
   0x1   :  { %12 = vsyncpa [#allocation3 + $0x1], 0 }
   0x2   :  { %13 = vsyncpa [#allocation6], 0 }
   0x3   :  { %14 = vsyncpa [#allocation4], 0 }
   0x4   :  { %16 = vsyncpa [#allocation4 + $0x1], 0  ;;  %s804_s18 = smov 0   ;;  %s806_s19 = smov 0  }
   0x5   :  { %s808_s20 = smov 0   ;;  %s810_s21 = smov 0  }
   0x6 LB: > { %s825_s22 = sadd.s32 4294967295, %s764_s21   ;;  %s479_s23 = sadd.s32 4294967294, %s764_s21   ;;  %s764_s21 = sphi %s810_s21, %s1041_s21   ;;  %s760_s20 = sphi %s808_s20, %s1040_s20   ;;  %s756_s19 = sphi %s806_s19, %s1039_s19   ;;  %s752_s18 = sphi %s804_s18, %s1038_s18  }
   0x7   : > { %p42_p0 = scmp.ne.s32.totalorder %s756_s19, %s752_s18  ;;  %p1022_p1 = scmp.eq.s32.totalorder %s825_s22, 0 }
   0x8   : > { %p156_p3 = scmp.eq.s32.totalorder %s479_s23, 1  ;;  %p480_p5 = scmp.ge.s32.totalorder %s764_s21, 1 }
   0x9   : > { %p834_p4 = por %p1022_p1, %p42_p0  ;;  %p163_p7 = scmp.lt.s32.totalorder %s764_s21, 3 }
   0xa   : > { %p839_p6 = por %p156_p3, %p42_p0  ;;  %s766_s27 = smov [#allocation5]  }
   0xb   : > { %s1025_s24 = scalar_select %p834_p4, 1, 0 }
   0xc   : > { %s1026_s25 = scalar_select %p839_p6, 1, 0 }
   0xd   : > { %p844_p8 = pnand %p480_p5, %p163_p7  ;;  %s175_s28 = sshll.u32 %s766_s27, 4  ;;  %s848_s28 = int_to_ptr.vmem [resolvable:$true] %s175_s28 }
   0xe   : > { %s860_s30 = sadd.s32 1, %s764_s21   ;;  %s29_s6 = sadd.s32 1, %s760_s20 }
   0xf   : > { %s1027_s26 = scalar_select %p844_p8, 1, 0 }
  0x10   : > { %p580_p9 = pneg %p844_p8  ;;  %s26_s7 = ssub.s32 %s764_s21, %s860_s30 }
  0x11   : > { %s636_s10 = scalar_lea.hbm %s1017_s1, 2048 }
  0x12   : > { %p855_p11 = pnand %p580_p9, %p1022_p1  ;;  %p637_p12 = scmp.ne.s32.totalorder %s1017_s1, %s636_s10 }
  0x13   : > { %p643_p5 = scmp.lt.u32.totalorder %s636_s10, %s1017_s1 }
  0x14   : > { %p638_p13 = pneg %p855_p11 }
  0x16   : > { %p639_p0 = pnand %p638_p13, %p637_p12 }
  0x18   : > { %p640_p3 = pneg %p639_p0 }
  0x1a   : > { %p645_p7 = pnand %p643_p5, %p640_p3 }
  0x1c   : > { %648 = shalt.err (!%p645_p7)
}
  0x1d   : > { %s649_s15 = scalar_lea.vmem %s848_s28, 2048  ;;  %p657_p2 = scmp.lt.s32.totalorder %s848_s28, %s848_s28 }
  0x1e   : > { %p650_p9 = scmp.ne.s32.totalorder %s848_s28, %s649_s15  ;;  %p658_p6 = scmp.lt.s32.totalorder %s649_s15, %s649_s15 }
  0x20   : > { %p652_p10 = pnand %p650_p9, %p638_p13  ;;  %p659_p4 = por %p658_p6, %p657_p2 }
  0x22   : > { %p653_p1 = pneg %p652_p10 }
  0x24   : > { %p660_p8 = pnand %p659_p4, %p653_p1 }
  0x26   : > { %663 = shalt.err (!%p660_p8)
}
  0x27   : > { %s767_s16 = smov 128   ;;  %s768_s17 = smov 8  }
  0x28   : > { %583 = dma.hbm_to_vmem [thread:$0]  (!%p855_p11), %s1017_s1, 2048, %s848_s28, [#allocation6], %s767_s16, %s767_s16, %s768_s17  }
  0x29   : > { %p27_p2 = scmp.eq.s32.totalorder %s26_s7, 0  ;;  %p36_p1 = scmp.ne.s32.totalorder %s760_s20, %s756_s19 }
  0x2a   : > { %p37_p4 = scmp.eq.s32.totalorder %s764_s21, 0  ;;  %p593_p6 = scmp.lt.s32.totalorder %s764_s21, 2 }
  0x2b   : > { %s891_s8 = scalar_select %p27_p2, %s760_s20, %s29_s6  }
  0x2c   : > { %p38_p8 = por %p37_p4, %p36_p1  ;;  %p1029_p10 = scmp.eq.s32.totalorder %s825_s22, 1 }
  0x2d   : > { %s198_s10 = sand.u32 1, %s760_s20   ;;  %s484_s11 = sshll.u32 %s764_s21, 7 }
  0x2e   : > { %p895_p12 = por %p1029_p10, %p36_p1  ;;  %s483_s12 = sshll.u32 %s198_s10, 3 }
  0x2f   : > { %s904_s14 = scalar_lea.hbm %s1016_s0, %s484_s11  ;;  %s202_s28 = scalar_lea.vmem [#allocation2], %s483_s12 }
  0x30   : > { %s209_s6 = sshll.u32 %s202_s28, 4  ;;  %p906_p11 = pnand %p593_p6, %p38_p8  ;;  %s910_s6 = int_to_ptr.vmem [resolvable:$true] %s209_s6 }
  0x31   : > { %s199_s15 = scalar_lea.sflag [#allocation3], %s198_s10  ;;  %s664_s16 = scalar_lea.hbm %s904_s14, 128 }
  0x32   : > { %p665_p13 = scmp.ne.s32.totalorder %s904_s14, %s664_s16  ;;  %p666_p0 = pneg %p906_p11 }
  0x33   : > { %s669_s27 = scalar_lea.hbm %s1016_s0, 256  ;;  %p670_p7 = scmp.lt.u32.totalorder %s904_s14, %s1016_s0 }
  0x34   : > { %p667_p3 = pnand %p666_p0, %p665_p13  ;;  %p671_p9 = scmp.lt.u32.totalorder %s669_s27, %s664_s16 }
  0x35   : > { %p673_p1 = scmp.lt.u32.totalorder %s664_s16, %s904_s14 }
  0x36   : > { %p668_p5 = pneg %p667_p3  ;;  %p672_p2 = por %p671_p9, %p670_p7 }
  0x38   : > { %p674_p4 = por %p673_p1, %p672_p2 }
  0x3a   : > { %p675_p6 = pnand %p674_p4, %p668_p5 }
  0x3c   : > { %678 = shalt.err (!%p675_p6)
}
  0x3d   : > { %s679_s10 = scalar_lea.vmem %s910_s6, 128  ;;  %s769_s29 = smov [#allocation2]  }
  0x3e   : > { %p680_p8 = scmp.ne.s32.totalorder %s910_s6, %s679_s10  ;;  %s684_s13 = sshll.u32 %s769_s29, 4  ;;  %s685_s13 = int_to_ptr.vmem [resolvable:$false] %s684_s13 }
  0x3f   : > { %s686_s28 = scalar_lea.vmem %s685_s13, 256  ;;  %p687_p3 = scmp.lt.s32.totalorder %s910_s6, %s685_s13 }
  0x40   : > { %p682_p10 = pnand %p680_p8, %p666_p0  ;;  %p688_p7 = scmp.lt.s32.totalorder %s686_s28, %s679_s10 }
  0x42   : > { %p683_p13 = pneg %p682_p10  ;;  %p689_p9 = por %p688_p7, %p687_p3 }
  0x44   : > { %p690_p2 = pnand %p689_p9, %p683_p13 }
  0x46   : > { %693 = shalt.err (!%p690_p2)
}
  0x47   : > { %587 = dma.hbm_to_vmem [thread:$0]  (!%p906_p11), %s904_s14, 128, %s910_s6, %s199_s15  }
  0x48   : > { %p1032_p5 = scmp.ne.s32.totalorder %s1027_s26, 0 }
  0x49   : > { %s940_s16 = sand.u32 (!%p1032_p5), 1, %s756_s19   ;;  %p1033_p0 = scmp.ne.s32.totalorder (!%p1032_p5), %s1025_s24, 0 }
  0x4a   : > { %218 = sbr.rel (%p1032_p5) target bundleno = 661 (0x295), region = 40  ;;  %s486_s17 = sshll.u32 (!%p1032_p5), %s940_s16, 3 }
  0x4b   : > { %s221_s23 = scalar_lea.sflag (!%p1032_p5), [#allocation3], %s940_s16  ;;  %s946_s27 = scalar_lea.vmem (!%p1032_p5), [#allocation2], %s486_s17 }
  0x51   : > { %739 = dma.done.wait (%p1033_p0), %s221_s23, 128  }
  0x52   : > { %741 = vsyncadd (%p1033_p0), %s221_s23, 4294967168  ;;  %p1034_p11 = scmp.eq.s32.totalorder %s825_s22, 0 }
  0x54   : > { %743 = dma.done.wait (%p1034_p11), [#allocation6], 2048   ;;  %p1035_p1 = pmov %p1034_p11 }
  0x55   : > { %v770_v0 = vmov 0.0|0.0   ;;  %vm771_vm0 = vmmov 0   ;;  %v772_v1 = vmov 0.0   ;;  %v256_v2 = vld [vmem:[#allocation5] sm:$0xff]  ;;  %v257_v3 = vld [vmem:[#allocation5 + $0x8] sm:$0xff]  ;;  %v258_v4 = vld [vmem:[#allocation5 + $0x10] sm:$0xff]  ;;  %v357_v32 = vlaneseq }
  0x56   : > { %745 = vsyncadd (%p1035_p1), [#allocation6], 4294965248  ;;  %548 = vmatprep.subr.bf16.mxu0 %v770_v0  ;;  %545 = vmatprep.mubr.msk.f32.mxu0 %vm771_vm0, %v772_v1  ;;  %v549_v5 = vpack.c.bf16 %v257_v3, %v256_v2  ;;  %v259_v6 = vld [vmem:[#allocation5 + $0x18] sm:$0xff]  ;;  %v260_v8 = vld [vmem:[#allocation5 + $0x20] sm:$0xff]  ;;  %s493_s11 = sshll.u32 %s825_s22, 7  ;;  %s254_s12 = scalar_lea.vmem [#allocation7], %s486_s17 }
  0x57   : > { %v552_v7 = vpack.c.bf16 %v259_v6, %v258_v4  ;;  %v261_v9 = vld [vmem:[#allocation5 + $0x28] sm:$0xff]  ;;  %v262_v11 = vld [vmem:[#allocation5 + $0x30] sm:$0xff]  ;;  %v263_v12 = vld [vmem:[#allocation5 + $0x38] sm:$0xff]  ;;  %v358_v33 = vand.u32 127, %v357_v32  ;;  %s399_s10 = sshll.u32 %s254_s12, 4  ;;  %s972_s28 = scalar_lea.hbm %s1021_s5, %s493_s11  ;;  %s974_s10 = int_to_ptr.vmem [resolvable:$true] %s399_s10 }
  0x58   : > { %550 = vmatpush3.bf16.msra.mxu0 %v549_v5  ;;  %v555_v10 = vpack.c.bf16 %v261_v9, %v260_v8  ;;  %v558_v13 = vpack.c.bf16 %v263_v12, %v262_v11  ;;  %v264_v14 = vld [vmem:[#allocation5 + $0x40] sm:$0xff]  ;;  %v265_v15 = vld [vmem:[#allocation5 + $0x48] sm:$0xff]  ;;  %v266_v17 = vld [vmem:[#allocation5 + $0x50] sm:$0xff]  ;;  %s386_s23 = scalar_lea.sflag [#allocation4], %s940_s16  ;;  %s773_s22 = smov [#allocation7]  }
  0x59   : > { %551 = vmatprep.subr.bf16.mxu0 %v770_v0  ;;  %v561_v16 = vpack.c.bf16 %v265_v15, %v264_v14  ;;  %v267_v18 = vld [vmem:[#allocation5 + $0x58] sm:$0xff]  ;;  %v268_v20 = vld [vmem:[#allocation5 + $0x60] sm:$0xff]  ;;  %v269_v21 = vld [vmem:[#allocation5 + $0x68] sm:$0xff]  ;;  %vm359_vm1 = vcmp.lt.s32.totalorder %v358_v33, 32  ;;  %s698_s17 = sshll.u32 %s773_s22, 4  ;;  %s699_s17 = int_to_ptr.vmem [resolvable:$false] %s698_s17 }
  0x5a   : > { %v564_v19 = vpack.c.bf16 %v267_v18, %v266_v17  ;;  %v567_v22 = vpack.c.bf16 %v269_v21, %v268_v20  ;;  %v270_v23 = vld [vmem:[#allocation5 + $0x70] sm:$0xff]  ;;  %v271_v24 = vld [vmem:[#allocation5 + $0x78] sm:$0xff]  ;;  %s700_s24 = scalar_lea.vmem %s699_s17, 256  ;;  %p701_p10 = scmp.lt.s32.totalorder %s974_s10, %s699_s17 }
  0x5b   : > { %v570_v25 = vpack.c.bf16 %v271_v24, %v270_v23  ;;  %v255_v26 = vld [vmem:[%s946_s27] sm:$0xff]  ;;  %s694_s27 = scalar_lea.vmem %s974_s10, 128 }
  0x5c   : > { %553 = vmatpush3.bf16.msra.mxu0 %v552_v7  ;;  %v489_v28 = vld [vmem:[%s1018_s2] ss:$0 sm:$0xff]  ;;  %p695_p4 = scmp.ne.s32.totalorder %s974_s10, %s694_s27  ;;  %p702_p13 = scmp.lt.s32.totalorder %s700_s24, %s694_s27 }
  0x5d   : > { %554 = vmatprep.subr.bf16.mxu0 %v770_v0  ;;  %v490_v43 = vld [vmem:[%s1019_s3] ss:$0 sm:$0xff] }
  0x5e   : > { %v491_v45 = vld [vmem:[%s1020_s4] ss:$0 sm:$0xff]  ;;  %p696_p6 = pnand %p695_p4, %p895_p12  ;;  %p703_p3 = por %p702_p13, %p701_p10 }
  0x60   : > { %556 = vmatpush3.bf16.msra.mxu0 %v555_v10  ;;  %p697_p8 = pneg %p696_p6 }
  0x61   : > { %557 = vmatprep.subr.bf16.mxu0 %v770_v0 }
  0x62   : > { %p704_p7 = pnand %p703_p3, %p697_p8 }
  0x64   : > { %559 = vmatpush3.bf16.msra.mxu0 %v558_v13 }
  0x65   : > { %560 = vmatprep.subr.bf16.mxu0 %v770_v0 }
  0x68   : > { %562 = vmatpush3.bf16.msra.mxu0 %v561_v16 }
  0x69   : > { %563 = vmatprep.subr.bf16.mxu0 %v770_v0 }
  0x6c   : > { %565 = vmatpush3.bf16.msra.mxu0 %v564_v19 }
  0x6d   : > { %566 = vmatprep.subr.bf16.mxu0 %v770_v0 }
  0x70   : > { %568 = vmatpush3.bf16.msra.mxu0 %v567_v22 }
  0x71   : > { %569 = vmatprep.subr.bf16.mxu0 %v770_v0 }
  0x74   : > { %571 = vmatpush3.bf16.msra.mxu0 %v570_v25 }
  0x77   : > { %546 = vmatmul.mubr.f32.vlgmr.msra.gmra.mrb[0].mxu0 %v255_v26 }
 0x14a   : > { %v338_v27 = vpop.f32.mrb[0].mxu0 }
 0x14b   : > { %v342_v29 = vadd.f32 %v338_v27, %v255_v26  ;;  %v547_v30 = vpop.f32.mrb[1].mxu0 }
 0x14d   : > { %v350_v31 = vadd.f32 %v489_v28, %v342_v29 }
 0x14f   : > { %353 = vadd.xlane.f32.xlu0 %v350_v31 }
 0x1dc   : > { %v354_v34 = vpop.xlane.xlu0 %353 }
 0x1dd   : > { %v355_v35 = vmul.f32 0.03125, %v354_v34 }
 0x1df   : > { %v356_v36 = vsub.f32 %v350_v31, %v355_v35 }
 0x1e1   : > { %v362_v37 = vsel %vm359_vm1, %v356_v36, 0.0 }
 0x1e2   : > { %v363_v38 = vmul.f32 %v362_v37, %v362_v37 }
 0x1e4   : > { %364 = vadd.xlane.f32.xlu0 %v363_v38 }
 0x271   : > { %v365_v39 = vpop.xlane.xlu0 %364 }
 0x272   : > { %v366_v40 = vmul.f32 0.03125, %v365_v39 }
 0x274   : > { %v367_v41 = vadd.f32 1e-05, %v366_v40 }
 0x276   : > { %634 = vrsqrt.f32 %v367_v41 }
 0x280   : > { %v635_v42 = vpop.eup %634 }
 0x281   : > { %v369_v44 = vmul.f32 %v635_v42, %v362_v37 }
 0x283   : > { %v376_v46 = vmul.f32 %v490_v43, %v369_v44 }
 0x285   : > { %v383_v47 = vadd.f32 %v491_v45, %v376_v46 }
 0x287   : > { %384 = vst [vmem:[%s254_s12] sm:$0xff] %v383_v47 }
 0x288   : > { %707 = shalt.err (!%p704_p7)
}
 0x289   : > { %s708_s16 = scalar_lea.hbm %s972_s28, 128  ;;  %s712_s6 = scalar_lea.hbm %s1021_s5, 256 }
 0x28a   : > { %p709_p9 = scmp.ne.s32.totalorder %s972_s28, %s708_s16  ;;  %p713_p0 = scmp.lt.u32.totalorder %s972_s28, %s1021_s5 }
 0x28b   : > { %p714_p11 = scmp.lt.u32.totalorder %s712_s6, %s708_s16  ;;  %p716_p4 = scmp.lt.u32.totalorder %s708_s16, %s972_s28 }
 0x28c   : > { %p710_p2 = pnand %p709_p9, %p895_p12 }
 0x28d   : > { %p715_p1 = por %p714_p11, %p713_p0 }
 0x28e   : > { %p711_p5 = pneg %p710_p2 }
 0x28f   : > { %p717_p6 = por %p716_p4, %p715_p1 }
 0x291   : > { %p718_p8 = pnand %p717_p6, %p711_p5 }
 0x293   : > { %721 = shalt.err (!%p718_p8)
}
 0x294   : > { %578 = dma.vmem_to_hbm [thread:$0]  (%p895_p12), %s974_s10, 128, %s972_s28, %s386_s23  }
 0x295 PF: > { %s411_s11 = sand.u32 1, %s752_s18   ;;  %p1036_p10 = scmp.ne.s32.totalorder %s1026_s25, 0 }
 0x296   : > { %p1037_p13 = scmp.ge.s32.totalorder %s764_s21, 2  ;;  %s412_s12 = scalar_lea.sflag [#allocation4], %s411_s11 }
 0x298   : > { %p589_p3 = pnand %p1037_p13, %p1036_p10 }
 0x29a   : > { %747 = dma.done.wait (!%p589_p3), %s412_s12, 128  }
 0x29b   : > { %749 = vsyncadd (!%p589_p3), %s412_s12, 4294967168  ;;  %p19_p7 = scmp.ge.s32.totalorder %s860_s30, 4   ;;  %s1038_s18 = smov %s756_s19 }
 0x29c   : > { %s1039_s19 = smov %s760_s20  ;;  %s1040_s20 = smov %s891_s8 }
 0x29d   : > { %s1041_s21 = smov %s860_s30  ;;  %21 = sbr.rel (!%p19_p7) target bundleno = 6 (0x6), region = 89 }
 0x2a4   :  { %417 = vsyncpa [#allocation3], 1 }
 0x2a5   :  { %419 = vsyncpa [#allocation3 + $0x1], 1 }
 0x2a6   :  { %420 = vsyncpa [#allocation6], 1 }
 0x2a7   :  { %421 = vsyncpa [#allocation4], 1 }
 0x2a8   :  { %423 = vsyncpa [#allocation4 + $0x1], 1 }

</bundles_post_ra>
